<compile_context>
chip_gen: v6e
topology: v6e:2x2x1
jax: 0.10.0
libtpu: 0.0.40
codegen_flags: <defaults>
</compile_context>

<pallas_src>
import functools

import jax
import jax.numpy as jnp
from jax import lax
from jax.experimental import pallas as pl
from jax.experimental.pallas import tpu as pltpu

# Finite "minus infinity": avoids the -inf -> NaN hazard for fully-masked rows
# (such rows fall back to an unmasked softmax instead of NaN like the torch ref).
_NEG_BIG = -1e30


def _attention_kernel(*refs, gdim, head_dim, q_tile, has_mask, approx_recip):
    # Grid: (batch, query-tile, head-group); head-group is the innermost
    # reduction axis accumulating output-projection contributions.
    if has_mask:
        (x_ref, mask_ref, wq_ref, wk_ref, wv_ref, wo_ref,
         out_ref, k_cache, v_cache, acc_ref) = refs
    else:
        (x_ref, wq_ref, wk_ref, wv_ref, wo_ref,
         out_ref, k_cache, v_cache, acc_ref) = refs
        mask_ref = None

    qi = pl.program_id(1)
    hg = pl.program_id(2)
    cd = k_cache.dtype                      # compute dtype (bf16 fast path)
    G = gdim // head_dim                    # heads per group (static)
    # Contract the last axes: x @ W.T and q @ k.T without explicit transposes.
    nt = (((1,), (1,)), ((), ()))

    # Per-group slices of the VMEM-resident full weights (sublane-dim slices).
    hg_start = pl.multiple_of(hg * gdim, gdim)
    wq_g = wq_ref[pl.ds(hg_start, gdim), :]          # (gdim, C), scale pre-folded
    wo_g = wo_ref[pl.ds(hg_start, gdim), :]          # (gdim, C)

    @pl.when(hg == 0)
    def _():
        acc_ref[...] = jnp.zeros_like(acc_ref)

    # K/V for this (batch, head-group): computed once per batch at the first
    # query tile, cached in VMEM and reused for every later query tile.
    @pl.when(qi == 0)
    def _():
        xkv = x_ref[...]                              # (L, C)
        wk_g = wk_ref[pl.ds(hg_start, gdim), :]
        wv_g = wv_ref[pl.ds(hg_start, gdim), :]
        k_cache[hg] = lax.dot_general(
            xkv, wk_g, nt, preferred_element_type=jnp.float32).astype(cd)
        v_cache[hg] = lax.dot_general(
            xkv, wv_g, nt, preferred_element_type=jnp.float32).astype(cd)

    # Query tile sliced in-kernel from the resident x block (no second x input).
    q_start = pl.multiple_of(qi * q_tile, q_tile)
    xq = x_ref[pl.ds(q_start, q_tile), :]             # (TQ, C)

    # Wide (gdim) projection for the whole head group on the MXU.
    q_g = lax.dot_general(
        xq, wq_g, nt, preferred_element_type=jnp.float32).astype(cd)   # (TQ, gdim)
    k_g = k_cache[hg]                                  # (L, gdim)
    v_g = v_cache[hg]                                  # (L, gdim)

    keep = (mask_ref[...] != 0) if has_mask else None  # (TQ, L) bool

    # Per-head attention within the group (head_dim contraction is inherent).
    ctx_parts = []
    for g in range(G):                                 # static, unrolled
        sl = slice(g * head_dim, (g + 1) * head_dim)
        s = lax.dot_general(q_g[:, sl], k_g[:, sl], nt,
                            preferred_element_type=jnp.float32)        # (TQ, L)
        if keep is not None:
            s = jnp.where(keep, s, _NEG_BIG)           # single select on int8 mask
        s = s - jnp.max(s, axis=-1, keepdims=True)
        p = jnp.exp(s)
        denom = jnp.sum(p, axis=-1, keepdims=True)
        ctx = jnp.dot(p.astype(cd), v_g[:, sl],
                      preferred_element_type=jnp.float32)              # (TQ, hd)
        # Normalize AFTER the PV matmul: (TQ, hd) multiply instead of (TQ, L).
        if approx_recip:
            ctx = ctx * pl.reciprocal(denom, approx=True)
        else:
            ctx = ctx / denom
        ctx_parts.append(ctx.astype(cd))

    ctx_g = ctx_parts[0] if G == 1 else jnp.concatenate(ctx_parts, axis=-1)  # (TQ, gdim)

    # Fused output projection with a wide (gdim) contraction; accumulated
    # across head groups into the f32 scratch.
    acc_ref[...] += jnp.dot(ctx_g, wo_g, preferred_element_type=jnp.float32)

    @pl.when(hg == pl.num_programs(2) - 1)
    def _():
        out_ref[...] = acc_ref[...].astype(out_ref.dtype)


def attention(x, wq, wk, wv, wo, mask=None, *, head_dim=64, q_tile=None,
              group_width=256, compute_dtype=jnp.bfloat16,
              approx_reciprocal=True):
    """Pallas forward of the PyTorch `Attention` module (bias-free path).

    x:  (B, L, C) float32
    wq, wk, wv, wo: (C, C) torch nn.Linear `.weight` layout (out, in)
    mask: optional (B, L, L) bool; True = keep (torch: masked_fill(~mask, -inf))
    group_width: target head-group width in lanes (256 for v6e/v7x, 128 for v5e)
    """
    B, L, C = x.shape
    assert C % head_dim == 0, "dim must be divisible by head_dim"
    H = C // head_dim
    scale = float(head_dim) ** -0.5

    # --- query tile selection (must divide L; multiple of 8 unless full L) ---
    if q_tile is None:
        q_tile = min(L, 128)
    q_tile = max(1, min(q_tile, L))
    valid = [t for t in range(1, L + 1) if L % t == 0 and (t == L or t % 8 == 0)]
    q_tile = max([t for t in valid if t <= q_tile] or [L])
    num_q = L // q_tile
    # TODO(synk): pad L (and the mask) to a multiple of 128 for production shapes.

    # --- head grouping: largest divisor of H with G*head_dim <= group_width ---
    G = 1
    for g in range(1, H + 1):
        if H % g == 0 and g * head_dim <= max(group_width, head_dim):
            G = g
    gdim = G * head_dim
    num_hg = H // G

    cd = compute_dtype
    x_c = x.astype(cd)
    wq_c = (wq * scale).astype(cd)      # softmax scale folded into Wq (once)
    wk_c = wk.astype(cd)
    wv_c = wv.astype(cd)
    wo_t = wo.T.astype(cd)              # (in, out) so the kernel row-slices per group

    has_mask = mask is not None

    # x: one resident (L, C) block per batch (query tiles sliced in-kernel).
    in_specs = [pl.BlockSpec((pl.Squeezed(), L, C), lambda b, qi, hg: (b, 0, 0))]
    inputs = [x_c]
    if has_mask:
        in_specs.append(pl.BlockSpec((pl.Squeezed(), q_tile, L),
                                     lambda b, qi, hg: (b, qi, 0)))
        inputs.append(mask.astype(jnp.int8))   # 4x less HBM traffic than f32
    # Weights: constant block index => DMA'd into VMEM once, resident for the
    # whole kernel; per-group slices are taken in-kernel.
    const_w = pl.BlockSpec((C, C), lambda b, qi, hg: (0, 0))
    in_specs += [const_w, const_w, const_w, const_w]
    inputs += [wq_c, wk_c, wv_c, wo_t]

    kernel = functools.partial(
        _attention_kernel, gdim=gdim, head_dim=head_dim, q_tile=q_tile,
        has_mask=has_mask, approx_recip=approx_reciprocal)

    # --- VMEM budget (advisory; clamped to safe bounds) ---
    isz = jnp.dtype(cd).itemsize
    est = (4 * C * C * isz * 2            # resident weights (worst-case 2 bufs)
           + 2 * L * C * isz              # x block, double buffered
           + 2 * L * gdim * num_hg * isz  # K/V caches
           + (2 * q_tile * L if has_mask else 0)
           + 2 * q_tile * C * x.dtype.itemsize
           + q_tile * C * 4               # f32 accumulator
           + 4 * q_tile * L * 4 + 2 * q_tile * C * 4   # scores/p/ctx intermediates
           + (2 << 20))
    vmem_limit = int(min(max(est, 32 * 2**20), 96 * 2**20))

    return pl.pallas_call(
        kernel,
        out_shape=jax.ShapeDtypeStruct((B, L, C), x.dtype),
        grid_spec=pltpu.PrefetchScalarGridSpec(
            num_scalar_prefetch=0,
            grid=(B, num_q, num_hg),
            in_specs=in_specs,
            out_specs=pl.BlockSpec((pl.Squeezed(), q_tile, C),
                                   lambda b, qi, hg: (b, qi, 0)),
            scratch_shapes=[
                pltpu.VMEM((num_hg, L, gdim), cd),      # K cache (per batch)
                pltpu.VMEM((num_hg, L, gdim), cd),      # V cache (per batch)
                pltpu.VMEM((q_tile, C), jnp.float32),   # output-proj accumulator
            ],
        ),
        # qi and hg must stay sequential (K/V cache + head-group reduction);
        # the batch axis provides the megacore-parallel extent on v7x.
        compiler_params=pltpu.CompilerParams(
            dimension_semantics=("parallel", "arbitrary", "arbitrary"),
            vmem_limit_bytes=vmem_limit),
    )(*inputs)


def attention_ref(x, wq, wk, wv, wo, mask=None, *, head_dim):
    """Pure-JAX reference mirroring the PyTorch module."""
    B, L, C = x.shape
    H = C // head_dim
    scale = head_dim ** (-0.5)
    q = (x @ wq.T).reshape(B, L, H, head_dim).transpose(0, 2, 1, 3)
    k = (x @ wk.T).reshape(B, L, H, head_dim).transpose(0, 2, 1, 3)
    v = (x @ wv.T).reshape(B, L, H, head_dim).transpose(0, 2, 1, 3)
    attn = jnp.einsum("bhnd,bhmd->bhnm", q, k) * scale
    if mask is not None:
        attn = jnp.where(mask[:, None, :, :], attn, -jnp.inf)
    attn = jax.nn.softmax(attn, axis=-1)
    o = jnp.einsum("bhnm,bhmd->bhnd", attn, v)
    o = o.transpose(0, 2, 1, 3).reshape(B, L, C)
    return o @ wo.T


if __name__ == "__main__":
    # Small shapes: dim=64, head_dim=16 -> 4 heads, seq=16, batch=2.
    B, L, C, HEAD_DIM = 2, 16, 64, 16

    key = jax.random.PRNGKey(0)
    kx, kq, kk, kv, ko, km = jax.random.split(key, 6)

    x = jax.random.normal(kx, (B, L, C), dtype=jnp.float32)
    wq = jax.random.normal(kq, (C, C), dtype=jnp.float32) * (C ** -0.5)
    wk = jax.random.normal(kk, (C, C), dtype=jnp.float32) * (C ** -0.5)
    wv = jax.random.normal(kv, (C, C), dtype=jnp.float32) * (C ** -0.5)
    wo = jax.random.normal(ko, (C, C), dtype=jnp.float32) * (C ** -0.5)

    # Random keep-mask with the diagonal forced on (no fully-masked rows).
    mask = jax.random.bernoulli(km, 0.7, (B, L, L)) | jnp.eye(L, dtype=bool)[None]

    # 1) f32 compute, exact softmax, no mask; exercises query tiling (num_q=2),
    #    multiple head groups (group_width=32 -> G=2, num_hg=2) and K/V caching.
    out = attention(x, wq, wk, wv, wo, mask=None, head_dim=HEAD_DIM,
                    q_tile=8, group_width=32, compute_dtype=jnp.float32,
                    approx_reciprocal=False)
    out = jax.block_until_ready(out)
    ref = attention_ref(x, wq, wk, wv, wo, mask=None, head_dim=HEAD_DIM)
    assert out.shape == (B, L, C)
    assert jnp.allclose(out, ref, atol=2e-2, rtol=2e-2), "f32 / no-mask mismatch"

    # 2) f32 compute with the int8 mask path (single head group, full-L q tile).
    out_m = attention(x, wq, wk, wv, wo, mask=mask, head_dim=HEAD_DIM,
                      compute_dtype=jnp.float32)
    out_m = jax.block_until_ready(out_m)
    ref_m = attention_ref(x, wq, wk, wv, wo, mask=mask, head_dim=HEAD_DIM)
    assert jnp.allclose(out_m, ref_m, atol=2e-2, rtol=2e-2), "f32 / mask mismatch"

    # 3) default bf16 fast path (MXU-native on v6e/v7x) with mask; looser tol.
    out_bf = attention(x, wq, wk, wv, wo, mask=mask, head_dim=HEAD_DIM)
    out_bf = jax.block_until_ready(out_bf)
    assert jnp.allclose(out_bf, ref_m, atol=1e-1, rtol=1e-1), "bf16 / mask mismatch"

    print("KERNEL_OK")
</pallas_src>

<mosaic_0001>
module attributes {stable_mosaic.version = 11 : i64} {
  func.func @_attention_kernel(%arg0: i32, %arg1: i32, %arg2: i32, %arg3: memref<1x16x64xf32, #tpu.memory_space<vmem>>, %arg4: memref<64x64xf32, #tpu.memory_space<vmem>>, %arg5: memref<64x64xf32, #tpu.memory_space<vmem>>, %arg6: memref<64x64xf32, #tpu.memory_space<vmem>>, %arg7: memref<64x64xf32, #tpu.memory_space<vmem>>, %arg8: memref<1x8x64xf32, #tpu.memory_space<vmem>>, %arg9: memref<2x16x32xf32, #tpu.memory_space<vmem>>, %arg10: memref<2x16x32xf32, #tpu.memory_space<vmem>>, %arg11: memref<8x64xf32, #tpu.memory_space<vmem>>) attributes {dimension_semantics = [#tpu.dimension_semantics<parallel>, #tpu.dimension_semantics<arbitrary>, #tpu.dimension_semantics<arbitrary>], iteration_bounds = array<i64: 2, 2, 2>, scalar_prefetch = 0 : i64, scratch_operands = 3 : i64, tpu.core_type = #tpu.core_type<tc>, window_params = [{transform_indices = @transform_0, window_bounds = array<i64: 1, 16, 64>}, {pipeline_mode = #tpu.pipeline_mode<synchronous>, transform_indices = @transform_1, window_bounds = array<i64: 64, 64>}, {pipeline_mode = #tpu.pipeline_mode<synchronous>, transform_indices = @transform_2, window_bounds = array<i64: 64, 64>}, {pipeline_mode = #tpu.pipeline_mode<synchronous>, transform_indices = @transform_3, window_bounds = array<i64: 64, 64>}, {pipeline_mode = #tpu.pipeline_mode<synchronous>, transform_indices = @transform_4, window_bounds = array<i64: 64, 64>}, {transform_indices = @transform_5, window_bounds = array<i64: 1, 8, 64>}]} {
    %c32_i32 = arith.constant 32 : i32
    %0 = arith.muli %arg2, %c32_i32 : i32
    %1 = tpu.assume_multiple %0, 32 : i32
    %2 = arith.index_cast %1 : i32 to index
    %c0 = arith.constant 0 : index
    %3 = vector.load %arg4[%2, %c0] : memref<64x64xf32, #tpu.memory_space<vmem>>, vector<32x64xf32>
    %4 = arith.index_cast %1 : i32 to index
    %c0_0 = arith.constant 0 : index
    %5 = vector.load %arg7[%4, %c0_0] : memref<64x64xf32, #tpu.memory_space<vmem>>, vector<32x64xf32>
    %c0_i32 = arith.constant 0 : i32
    %6 = arith.cmpi eq, %arg2, %c0_i32 : i32
    %7 = arith.extui %6 : i1 to i32
    %c0_i32_1 = arith.constant 0 : i32
    %8 = arith.cmpi ne, %7, %c0_i32_1 : i32
    scf.if %8 {
      %cst_24 = arith.constant 0.000000e+00 : f32
      %60 = vector.broadcast %cst_24 : f32 to vector<8x64xf32>
      %c0_25 = arith.constant 0 : index
      %c0_26 = arith.constant 0 : index
      %61 = vector.load %arg11[%c0_25, %c0_26] : memref<8x64xf32, #tpu.memory_space<vmem>>, vector<8x64xf32>
      tpu.vector_store %arg11[%c0_25, %c0_26], %60 {strides = array<i32>} : memref<8x64xf32, #tpu.memory_space<vmem>>, vector<8x64xf32>,
    } else {
    }
    %c0_i32_2 = arith.constant 0 : i32
    %9 = arith.cmpi eq, %arg1, %c0_i32_2 : i32
    %10 = arith.extui %9 : i1 to i32
    %c0_i32_3 = arith.constant 0 : i32
    %11 = arith.cmpi ne, %10, %c0_i32_3 : i32
    scf.if %11 {
      %c0_24 = arith.constant 0 : index
      %c0_25 = arith.constant 0 : index
      %c0_26 = arith.constant 0 : index
      %60 = vector.load %arg3[%c0_24, %c0_25, %c0_26] : memref<1x16x64xf32, #tpu.memory_space<vmem>>, vector<1x16x64xf32>
      %61 = vector.shape_cast %60 : vector<1x16x64xf32> to vector<16x64xf32>
      %62 = arith.index_cast %1 : i32 to index
      %c0_27 = arith.constant 0 : index
      %63 = vector.load %arg5[%62, %c0_27] : memref<64x64xf32, #tpu.memory_space<vmem>>, vector<32x64xf32>
      %64 = arith.index_cast %1 : i32 to index
      %c0_28 = arith.constant 0 : index
      %65 = vector.load %arg6[%64, %c0_28] : memref<64x64xf32, #tpu.memory_space<vmem>>, vector<32x64xf32>
      %cst_29 = arith.constant dense<0.000000e+00> : vector<16x32xf32>
      %66 = tpu.matmul %61, %63, %cst_29 {dimension_numbers = #tpu.dot_dimension_numbers<[1], [1], [0], [0], [0, 0, 1, 0], [], []>} : vector<16x64xf32>, vector<32x64xf32>, vector<16x32xf32> -> vector<16x32xf32>
      %67 = arith.index_cast %arg2 : i32 to index
      %c0_30 = arith.constant 0 : index
      %c0_31 = arith.constant 0 : index
      %68 = vector.load %arg9[%67, %c0_30, %c0_31] : memref<2x16x32xf32, #tpu.memory_space<vmem>>, vector<1x16x32xf32>
      %69 = vector.shape_cast %68 : vector<1x16x32xf32> to vector<16x32xf32>
      %70 = vector.shape_cast %66 : vector<16x32xf32> to vector<1x16x32xf32>
      tpu.vector_store %arg9[%67, %c0_30, %c0_31], %70 {strides = array<i32>} : memref<2x16x32xf32, #tpu.memory_space<vmem>>, vector<1x16x32xf32>,
      %cst_32 = arith.constant dense<0.000000e+00> : vector<16x32xf32>
      %71 = tpu.matmul %61, %65, %cst_32 {dimension_numbers = #tpu.dot_dimension_numbers<[1], [1], [0], [0], [0, 0, 1, 0], [], []>} : vector<16x64xf32>, vector<32x64xf32>, vector<16x32xf32> -> vector<16x32xf32>
      %72 = arith.index_cast %arg2 : i32 to index
      %c0_33 = arith.constant 0 : index
      %c0_34 = arith.constant 0 : index
      %73 = vector.load %arg10[%72, %c0_33, %c0_34] : memref<2x16x32xf32, #tpu.memory_space<vmem>>, vector<1x16x32xf32>
      %74 = vector.shape_cast %73 : vector<1x16x32xf32> to vector<16x32xf32>
      %75 = vector.shape_cast %71 : vector<16x32xf32> to vector<1x16x32xf32>
      tpu.vector_store %arg10[%72, %c0_33, %c0_34], %75 {strides = array<i32>} : memref<2x16x32xf32, #tpu.memory_space<vmem>>, vector<1x16x32xf32>,
    } else {
    }
    %c8_i32 = arith.constant 8 : i32
    %12 = arith.muli %arg1, %c8_i32 : i32
    %13 = tpu.assume_multiple %12, 8 : i32
    %c0_4 = arith.constant 0 : index
    %14 = arith.index_cast %13 : i32 to index
    %c0_5 = arith.constant 0 : index
    %15 = vector.load %arg3[%c0_4, %14, %c0_5] : memref<1x16x64xf32, #tpu.memory_space<vmem>>, vector<1x8x64xf32>
    %16 = vector.shape_cast %15 : vector<1x8x64xf32> to vector<8x64xf32>
    %cst = arith.constant dense<0.000000e+00> : vector<8x32xf32>
    %17 = tpu.matmul %16, %3, %cst {dimension_numbers = #tpu.dot_dimension_numbers<[1], [1], [0], [0], [0, 0, 1, 0], [], []>} : vector<8x64xf32>, vector<32x64xf32>, vector<8x32xf32> -> vector<8x32xf32>
    %18 = arith.index_cast %arg2 : i32 to index
    %c0_6 = arith.constant 0 : index
    %c0_7 = arith.constant 0 : index
    %19 = vector.load %arg9[%18, %c0_6, %c0_7] : memref<2x16x32xf32, #tpu.memory_space<vmem>>, vector<1x16x32xf32>
    %20 = vector.shape_cast %19 : vector<1x16x32xf32> to vector<16x32xf32>
    %21 = arith.index_cast %arg2 : i32 to index
    %c0_8 = arith.constant 0 : index
    %c0_9 = arith.constant 0 : index
    %22 = vector.load %arg10[%21, %c0_8, %c0_9] : memref<2x16x32xf32, #tpu.memory_space<vmem>>, vector<1x16x32xf32>
    %23 = vector.shape_cast %22 : vector<1x16x32xf32> to vector<16x32xf32>
    %24 = vector.extract_strided_slice %17 {offsets = [0, 0], sizes = [8, 16], strides = [1, 1]} : vector<8x32xf32> to vector<8x16xf32>
    %25 = vector.extract_strided_slice %20 {offsets = [0, 0], sizes = [16, 16], strides = [1, 1]} : vector<16x32xf32> to vector<16x16xf32>
    %cst_10 = arith.constant dense<0.000000e+00> : vector<8x16xf32>
    %26 = tpu.matmul %24, %25, %cst_10 {dimension_numbers = #tpu.dot_dimension_numbers<[1], [1], [0], [0], [0, 0, 1, 0], [], []>} : vector<8x16xf32>, vector<16x16xf32>, vector<8x16xf32> -> vector<8x16xf32>
    %cst_11 = arith.constant dense<0xFF800000> : vector<8xf32>
    %27 = vector.multi_reduction <maximumf>, %26, %cst_11 [1] : vector<8x16xf32> to vector<8xf32>
    %28 = vector.shape_cast %27 : vector<8xf32> to vector<8x1xf32>
    %29 = vector.broadcast %28 : vector<8x1xf32> to vector<8x16xf32>
    %30 = arith.subf %26, %29 : vector<8x16xf32>
    %31 = math.exp %30 : vector<8x16xf32>
    %cst_12 = arith.constant dense<0.000000e+00> : vector<8xf32>
    %32 = vector.multi_reduction <add>, %31, %cst_12 [1] : vector<8x16xf32> to vector<8xf32>
    %33 = vector.shape_cast %32 : vector<8xf32> to vector<8x1xf32>
    %34 = vector.extract_strided_slice %23 {offsets = [0, 0], sizes = [16, 16], strides = [1, 1]} : vector<16x32xf32> to vector<16x16xf32>
    %cst_13 = arith.constant dense<0.000000e+00> : vector<8x16xf32>
    %35 = tpu.matmul %31, %34, %cst_13 {dimension_numbers = #tpu.dot_dimension_numbers<[1], [0], [0], [1], [0, 0, 1, 1], [], []>} : vector<8x16xf32>, vector<16x16xf32>, vector<8x16xf32> -> vector<8x16xf32>
    %36 = vector.broadcast %33 : vector<8x1xf32> to vector<8x16xf32>
    %37 = arith.divf %35, %36 : vector<8x16xf32>
    %38 = vector.extract_strided_slice %17 {offsets = [0, 16], sizes = [8, 16], strides = [1, 1]} : vector<8x32xf32> to vector<8x16xf32>
    %39 = vector.extract_strided_slice %20 {offsets = [0, 16], sizes = [16, 16], strides = [1, 1]} : vector<16x32xf32> to vector<16x16xf32>
    %cst_14 = arith.constant dense<0.000000e+00> : vector<8x16xf32>
    %40 = tpu.matmul %38, %39, %cst_14 {dimension_numbers = #tpu.dot_dimension_numbers<[1], [1], [0], [0], [0, 0, 1, 0], [], []>} : vector<8x16xf32>, vector<16x16xf32>, vector<8x16xf32> -> vector<8x16xf32>
    %cst_15 = arith.constant dense<0xFF800000> : vector<8xf32>
    %41 = vector.multi_reduction <maximumf>, %40, %cst_15 [1] : vector<8x16xf32> to vector<8xf32>
    %42 = vector.shape_cast %41 : vector<8xf32> to vector<8x1xf32>
    %43 = vector.broadcast %42 : vector<8x1xf32> to vector<8x16xf32>
    %44 = arith.subf %40, %43 : vector<8x16xf32>
    %45 = math.exp %44 : vector<8x16xf32>
    %cst_16 = arith.constant dense<0.000000e+00> : vector<8xf32>
    %46 = vector.multi_reduction <add>, %45, %cst_16 [1] : vector<8x16xf32> to vector<8xf32>
    %47 = vector.shape_cast %46 : vector<8xf32> to vector<8x1xf32>
    %48 = vector.extract_strided_slice %23 {offsets = [0, 16], sizes = [16, 16], strides = [1, 1]} : vector<16x32xf32> to vector<16x16xf32>
    %cst_17 = arith.constant dense<0.000000e+00> : vector<8x16xf32>
    %49 = tpu.matmul %45, %48, %cst_17 {dimension_numbers = #tpu.dot_dimension_numbers<[1], [0], [0], [1], [0, 0, 1, 1], [], []>} : vector<8x16xf32>, vector<16x16xf32>, vector<8x16xf32> -> vector<8x16xf32>
    %50 = vector.broadcast %47 : vector<8x1xf32> to vector<8x16xf32>
    %51 = arith.divf %49, %50 : vector<8x16xf32>
    %52 = tpu.concatenate %37, %51 in 1 : vector<8x16xf32>, vector<8x16xf32> -> vector<8x32xf32>
    %c0_18 = arith.constant 0 : index
    %c0_19 = arith.constant 0 : index
    %53 = vector.load %arg11[%c0_18, %c0_19] : memref<8x64xf32, #tpu.memory_space<vmem>>, vector<8x64xf32>
    %cst_20 = arith.constant dense<0.000000e+00> : vector<8x64xf32>
    %54 = tpu.matmul %52, %5, %cst_20 {dimension_numbers = #tpu.dot_dimension_numbers<[1], [0], [0], [1], [0, 0, 1, 1], [], []>} : vector<8x32xf32>, vector<32x64xf32>, vector<8x64xf32> -> vector<8x64xf32>
    %55 = arith.addf %53, %54 : vector<8x64xf32>
    %c0_21 = arith.constant 0 : index
    %c0_22 = arith.constant 0 : index
    %56 = vector.load %arg11[%c0_21, %c0_22] : memref<8x64xf32, #tpu.memory_space<vmem>>, vector<8x64xf32>
    tpu.vector_store %arg11[%c0_21, %c0_22], %55 {strides = array<i32>} : memref<8x64xf32, #tpu.memory_space<vmem>>, vector<8x64xf32>,
    %c1_i32 = arith.constant 1 : i32
    %57 = arith.cmpi eq, %arg2, %c1_i32 : i32
    %58 = arith.extui %57 : i1 to i32
    %c0_i32_23 = arith.constant 0 : i32
    %59 = arith.cmpi ne, %58, %c0_i32_23 : i32
    scf.if %59 {
      %c0_24 = arith.constant 0 : index
      %c0_25 = arith.constant 0 : index
      %60 = vector.load %arg11[%c0_24, %c0_25] : memref<8x64xf32, #tpu.memory_space<vmem>>, vector<8x64xf32>
      %c0_26 = arith.constant 0 : index
      %c0_27 = arith.constant 0 : index
      %c0_28 = arith.constant 0 : index
      %61 = vector.load %arg8[%c0_26, %c0_27, %c0_28] : memref<1x8x64xf32, #tpu.memory_space<vmem>>, vector<1x8x64xf32>
      %62 = vector.shape_cast %61 : vector<1x8x64xf32> to vector<8x64xf32>
      %63 = vector.shape_cast %60 : vector<8x64xf32> to vector<1x8x64xf32>
      tpu.vector_store %arg8[%c0_26, %c0_27, %c0_28], %63 {strides = array<i32>} : memref<1x8x64xf32, #tpu.memory_space<vmem>>, vector<1x8x64xf32>,
    } else {
    }
    return
  }
  func.func @transform_0(%arg0: i32, %arg1: i32, %arg2: i32) -> (i32, i32, i32) {
    %c0_i32 = arith.constant 0 : i32
    %c0_i32_0 = arith.constant 0 : i32
    %c0_i32_1 = arith.constant 0 : i32
    return %arg0, %c0_i32, %c0_i32_0 : i32, i32, i32
  }
  func.func @transform_1(%arg0: i32, %arg1: i32, %arg2: i32) -> (i32, i32) {
    %c0_i32 = arith.constant 0 : i32
    %c0_i32_0 = arith.constant 0 : i32
    %c0_i32_1 = arith.constant 0 : i32
    return %c0_i32, %c0_i32_0 : i32, i32
  }
  func.func @transform_2(%arg0: i32, %arg1: i32, %arg2: i32) -> (i32, i32) {
    %c0_i32 = arith.constant 0 : i32
    %c0_i32_0 = arith.constant 0 : i32
    %c0_i32_1 = arith.constant 0 : i32
    return %c0_i32, %c0_i32_0 : i32, i32
  }
  func.func @transform_3(%arg0: i32, %arg1: i32, %arg2: i32) -> (i32, i32) {
    %c0_i32 = arith.constant 0 : i32
    %c0_i32_0 = arith.constant 0 : i32
    %c0_i32_1 = arith.constant 0 : i32
    return %c0_i32, %c0_i32_0 : i32, i32
  }
  func.func @transform_4(%arg0: i32, %arg1: i32, %arg2: i32) -> (i32, i32) {
    %c0_i32 = arith.constant 0 : i32
    %c0_i32_0 = arith.constant 0 : i32
    %c0_i32_1 = arith.constant 0 : i32
    return %c0_i32, %c0_i32_0 : i32, i32
  }
  func.func @transform_5(%arg0: i32, %arg1: i32, %arg2: i32) -> (i32, i32, i32) {
    %c0_i32 = arith.constant 0 : i32
    %c0_i32_0 = arith.constant 0 : i32
    return %arg0, %arg1, %c0_i32 : i32, i32, i32
  }
}

</mosaic_0001>

<bundles_post_ra>
// kernel: tpu_custom_call.1
= control target key start
LH: loop header
LB: loop body
LE: loop exit
PB: predicated region body
PF: predicated region fallthrough
CT: control target
= control target key end

     0   :  { %s2293_s0 = inlined_call_operand.hbm [shape: f32[2,16,64], index: 0, kind: input, shape index: {}]   ;;  %s2294_s1 = inlined_call_operand.hbm [shape: f32[64,64], index: 1, kind: input, shape index: {}]   ;;  %s2295_s2 = inlined_call_operand.hbm [shape: f32[64,64], index: 2, kind: input, shape index: {}]   ;;  %s2296_s3 = inlined_call_operand.hbm [shape: f32[64,64], index: 3, kind: input, shape index: {}]   ;;  %s2297_s4 = inlined_call_operand.hbm [shape: f32[64,64], index: 4, kind: input, shape index: {}]   ;;  %s2298_s5 = inlined_call_operand.hbm [shape: f32[2,16,64], index: 5, kind: output, shape index: {}]  }
   0x1   :  { %2309 = sst [smem:[#allocation26_spill]] %s2294_s1 }
   0x2   :  { %2310 = sst [smem:[#allocation27_spill]] %s2295_s2 }
   0x3   :  { %2311 = sst [smem:[#allocation28_spill]] %s2296_s3 }
   0x4   :  { %2312 = sst [smem:[#allocation29_spill]] %s2297_s4 }
   0x5   :  { %2313 = sst [smem:[#allocation30_spill]] %s2298_s5 }
   0x6   :  { %10 = vsyncpa [#allocation6], 0 }
   0x7   :  { %12 = vsyncpa [#allocation6 + $0x1], 0 }
   0x8   :  { %13 = vsyncpa [#allocation9], 0 }
   0x9   :  { %14 = vsyncpa [#allocation12], 0 }
   0xa   :  { %15 = vsyncpa [#allocation7], 0 }
   0xb   :  { %17 = vsyncpa [#allocation7 + $0x1], 0  ;;  %s1885_s18 = smov 0   ;;  %s1887_s19 = smov 0  }
   0xc   :  { %s1889_s20 = smov 0   ;;  %s1891_s21 = smov 0  }
   0xd   :  { %s1893_s22 = smov 0   ;;  %s1895_s23 = smov 0  }
   0xe   :  { %s1897_s24 = smov 0   ;;  %s1899_s25 = smov 0  }
   0xf   :  { %s1901_s26 = smov 0   ;;  %s1903_s27 = smov 0  }
  0x10   :  { %s1905_s28 = smov 0   ;;  %s1907_s29 = smov 0  }
  0x11   :  { %s1909_s30 = smov 0  }
  0x12 LB: > { %2314 = sst [smem:[#allocation19_spill]] %s1792_s18  ;;  %s1227_s6 = sadd.s32 4294967295, %s1840_s30   ;;  %s1840_s30 = sphi %s1909_s30, %s23_s30   ;;  %s1836_s29 = sphi %s1907_s29, %s2357_s29   ;;  %s1832_s28 = sphi %s1905_s28, %s2356_s28   ;;  %s1828_s27 = sphi %s1903_s27, %s2344_s27   ;;  %s1824_s26 = sphi %s1901_s26, %s2355_s26   ;;  %s1820_s25 = sphi %s1899_s25, %s2354_s25   ;;  %s1816_s24 = sphi %s1897_s24, %s2353_s24   ;;  %s1812_s23 = sphi %s1895_s23, %s2352_s23   ;;  %s1808_s22 = sphi %s1893_s22, %s2351_s22   ;;  %s1804_s21 = sphi %s1891_s21, %s2350_s21   ;;  %s1800_s20 = sphi %s1889_s20, %s2349_s20   ;;  %s1796_s19 = sphi %s1887_s19, %s2348_s19   ;;  %s1792_s18 = sphi %s1885_s18, %s2347_s18  }
  0x13   : > { %2315 = sst [smem:[#allocation20_spill]] %s1824_s26  ;;  %s1228_s7 = sadd.s32 4294967294, %s1840_s30  }
  0x14   : > { %2316 = sst [smem:[#allocation21_spill]] %s1828_s27  ;;  %p62_p0 = scmp.ne.s32.totalorder %s1808_s22, %s1804_s21 }
  0x15   : > { %p1951_p1 = scmp.eq.s32.totalorder %s1227_s6, 0  ;;  %p171_p2 = scmp.ne.s32.totalorder %s1800_s20, %s1796_s19 }
  0x16   : > { %p172_p3 = scmp.eq.s32.totalorder %s1227_s6, 7  ;;  %p177_p5 = scmp.ne.s32.totalorder %s1796_s19, %s1792_s18 }
  0x17   : > { %p1959_p4 = por %p1951_p1, %p62_p0  ;;  %p178_p7 = scmp.eq.s32.totalorder %s1228_s7, 7 }
  0x18   : > { %p1965_p6 = por %p172_p3, %p171_p2  ;;  %p1229_p8 = scmp.ge.s32.totalorder %s1840_s30, 1 }
  0x19   : > { %p185_p9 = scmp.lt.s32.totalorder %s1840_s30, 9  ;;  %p1971_p10 = por %p178_p7, %p177_p5 }
  0x1a   : > { %s2319_s10 = scalar_select %p1965_p6, 1, 0 }
  0x1b   : > { %s2321_s11 = scalar_select %p1971_p10, 1, 0 }
  0x1c   : > { %2320 = sst [smem:[#allocation22_spill]] %s2319_s10  ;;  %p1975_p11 = pnand %p1229_p8, %p185_p9 }
  0x1d   : > { %2322 = sst [smem:[#allocation23_spill]] %s2321_s11  ;;  %s1842_s13 = smov [#allocation8]  }
  0x1e   : > { %s197_s14 = sshll.u32 %s1842_s13, 4  ;;  %p1410_p12 = pneg %p1975_p11  ;;  %s198_s14 = int_to_ptr.vmem [resolvable:$true] %s197_s14 }
  0x1f   : > { %s1843_s16 = smov [#allocation11]   ;;  %s1575_s21 = scalar_lea.vmem %s198_s14, 1024 }
  0x20   : > { %p1983_p13 = pnand %p1410_p12, %p1951_p1  ;;  %s223_s17 = sshll.u32 %s1843_s16, 4  ;;  %s224_s17 = int_to_ptr.vmem [resolvable:$true] %s223_s17 }
  0x21   : > { %p1576_p2 = scmp.ne.s32.totalorder %s198_s14, %s1575_s21  ;;  %p1583_p7 = scmp.lt.s32.totalorder %s198_s14, %s198_s14 }
  0x22   : > { %p1566_p0 = pneg %p1983_p13  ;;  %p1584_p8 = scmp.lt.s32.totalorder %s1575_s21, %s1575_s21 }
  0x24   : > { %p1578_p3 = pnand %p1576_p2, %p1566_p0  ;;  %p1585_p9 = por %p1584_p8, %p1583_p7 }
  0x26   : > { %p1579_p5 = pneg %p1578_p3 }
  0x28   : > { %p1586_p12 = pnand %p1585_p9, %p1579_p5 }
  0x2a   : > { %1589 = shalt.err (!%p1586_p12)
}
  0x2b   : > { %s2302_s6 = smov 128   ;;  %s2303_s7 = smov 8  }
  0x2c   : > { %s2325_s1 = sld [smem:[#allocation26_spill]]  ;;  %s1601_s11 = scalar_lea.vmem %s224_s17, 1024 }
  0x2d   : > { %p1602_p2 = scmp.ne.s32.totalorder %s224_s17, %s1601_s11  ;;  %p1609_p5 = scmp.lt.s32.totalorder %s224_s17, %s224_s17 }
  0x2e   : > { %p1610_p8 = scmp.lt.s32.totalorder %s1601_s11, %s1601_s11 }
  0x2f   : > { %p1604_p3 = pnand %p1602_p2, %p1566_p0 }
  0x30   : > { %p1611_p9 = por %p1610_p8, %p1609_p5 }
  0x31   : > { %p1605_p7 = pneg %p1604_p3 }
  0x32   : > { %1413 = dma.hbm_to_vmem [thread:$0]  (!%p1983_p13), %s2325_s1, 1024, %s198_s14, [#allocation9], %s2302_s6, %s2302_s6, %s2303_s7  }
  0x33   : > { %p1612_p12 = pnand %p1611_p9, %p1605_p7 }
  0x35   : > { %1615 = shalt.err (!%p1612_p12)
}
  0x36   : > { %s2326_s3 = sld [smem:[#allocation28_spill]]  ;;  %s1846_s14 = smov [#allocation10]  }
  0x37   : > { %s210_s13 = sshll.u32 %s1846_s14, 4  ;;  %s1847_s16 = smov [#allocation13]   ;;  %s211_s13 = int_to_ptr.vmem [resolvable:$true] %s210_s13 }
  0x38   : > { %s236_s1 = sshll.u32 %s1847_s16, 4  ;;  %s1627_s5 = scalar_lea.vmem %s211_s13, 1024  ;;  %s237_s1 = int_to_ptr.vmem [resolvable:$true] %s236_s1 }
  0x39   : > { %p1628_p2 = scmp.ne.s32.totalorder %s211_s13, %s1627_s5  ;;  %p1635_p5 = scmp.lt.s32.totalorder %s211_s13, %s211_s13 }
  0x3a   : > { %p1636_p8 = scmp.lt.s32.totalorder %s1627_s5, %s1627_s5 }
  0x3b   : > { %p1630_p3 = pnand %p1628_p2, %p1566_p0 }
  0x3c   : > { %1419 = dma.hbm_to_vmem [thread:$0]  (!%p1983_p13), %s2326_s3, 1024, %s224_s17, [#allocation12], %s2302_s6, %s2302_s6, %s2303_s7  }
  0x3d   : > { %p1631_p7 = pneg %p1630_p3  ;;  %p1637_p9 = por %p1636_p8, %p1635_p5 }
  0x3f   : > { %p1638_p12 = pnand %p1637_p9, %p1631_p7 }
  0x41   : > { %1641 = shalt.err (!%p1638_p12)
}
  0x42   : > { %s2327_s2 = sld [smem:[#allocation27_spill]]  ;;  %s1653_s17 = scalar_lea.vmem %s237_s1, 1024 }
  0x43   : > { %p1654_p10 = scmp.ne.s32.totalorder %s237_s1, %s1653_s17  ;;  %p1661_p5 = scmp.lt.s32.totalorder %s237_s1, %s237_s1 }
  0x44   : > { %p1662_p7 = scmp.lt.s32.totalorder %s1653_s17, %s1653_s17 }
  0x45   : > { %p1656_p2 = pnand %p1654_p10, %p1566_p0 }
  0x46   : > { %p1663_p8 = por %p1662_p7, %p1661_p5 }
  0x47   : > { %p1657_p3 = pneg %p1656_p2 }
  0x48   : > { %1416 = dma.hbm_to_vmem [thread:$0]  (!%p1983_p13), %s2327_s2, 1024, %s211_s13, [#allocation9], %s2302_s6, %s2302_s6, %s2303_s7  }
  0x49   : > { %p1664_p9 = pnand %p1663_p8, %p1657_p3 }
  0x4b   : > { %1667 = shalt.err (!%p1664_p9)
}
  0x4c   : > { %s2328_s4 = sld [smem:[#allocation29_spill]]  ;;  %s35_s15 = sadd.s32 1, %s1828_s27 }
  0x4d   : > { %p36_p10 = scmp.ge.s32.totalorder %s35_s15, 2  ;;  %s38_s14 = sadd.s32 1, %s1832_s28 }
  0x4e   : > { %s42_s13 = sadd.s32 1, %s1836_s29  ;;  %p56_p0 = scmp.ne.s32.totalorder %s1812_s23, %s1808_s22 }
  0x4f   : > { %s2359_s15 = smov (%p36_p10, %s35_s15), 0  ;;  %s2361_s14 = smov (!%p36_p10, %s38_s14), %s1832_s28 }
  0x50   : > { %2329 = sst [smem:[#allocation24_spill]] %s2359_s15  ;;  %p57_p12 = scmp.eq.s32.totalorder %s1840_s30, 0 }
  0x51   : > { %p40_p2 = scmp.ge.s32.totalorder %s2361_s14, 2  ;;  %s49_s16 = sadd.s32 1, %s1812_s23 }
  0x52   : > { %1422 = dma.hbm_to_vmem [thread:$0]  (!%p1983_p13), %s2328_s4, 1024, %s237_s1, [#allocation12], %s2302_s6, %s2302_s6, %s2303_s7  }
  0x53   : > { %p2043_p3 = por %p57_p12, %p56_p0  ;;  %s161_s1 = sadd.s32 1, %s1800_s20 }
  0x54   : > { %s2363_s14 = smov (%p40_p2, %s2361_s14), 0  ;;  %s2365_s13 = smov (!%p40_p2, %s42_s13), %s1836_s29 }
  0x55   : > { %2331 = sst [smem:[#allocation25_spill]] %s2363_s14  ;;  %p1435_p13 = scmp.lt.s32.totalorder %s1840_s30, 8 }
  0x56   : > { %s250_s11 = sand.u32 1, %s1812_s23   ;;  %p44_p5 = scmp.ge.s32.totalorder %s2365_s13, 2 }
  0x57   : > { %s157_s17 = ssub.s32 %s1832_s28, %s2363_s14  ;;  %s1235_s5 = sshll.u32 %s250_s11, 4 }
  0x58   : > { %s1283_s21 = sshll.u32 %s1836_s29, 8  ;;  %s2367_s13 = smov (%p44_p5, %s2365_s13), 0 }
  0x59   : > { %s46_s6 = ssub.s32 %s1836_s29, %s2367_s13  ;;  %s2063_s3 = scalar_lea.hbm %s2293_s0, %s1283_s21 }
  0x5a   : > { %p47_p7 = scmp.eq.s32.totalorder %s46_s6, 0  ;;  %s158_s4 = sor.u32 %s157_s17, %s46_s6 }
  0x5b   : > { %p159_p8 = scmp.eq.s32.totalorder %s158_s4, 0  ;;  %s254_s15 = scalar_lea.vmem [#allocation5], %s1235_s5 }
  0x5c   : > { %s261_s27 = sshll.u32 %s254_s15, 4  ;;  %p2075_p9 = pnand %p1435_p13, %p2043_p3  ;;  %s262_s27 = int_to_ptr.vmem [resolvable:$true] %s261_s27 }
  0x5d   : > { %s2066_s10 = scalar_select %p47_p7, %s1812_s23, %s49_s16  }
  0x5e   : > { %s2069_s26 = scalar_select %p159_p8, %s1800_s20, %s161_s1  }
  0x5f   : > { %s251_s2 = scalar_lea.sflag [#allocation6], %s250_s11  ;;  %p1670_p10 = pneg %p2075_p9 }
  0x60   : > { %s1681_s7 = scalar_lea.vmem %s262_s27, 256  ;;  %s1848_s4 = smov [#allocation5]  }
  0x61   : > { %p1682_p0 = scmp.ne.s32.totalorder %s262_s27, %s1681_s7  ;;  %s1686_s6 = sshll.u32 %s1848_s4, 4  ;;  %s1687_s6 = int_to_ptr.vmem [resolvable:$false] %s1686_s6 }
  0x62   : > { %s1688_s15 = scalar_lea.vmem %s1687_s6, 512  ;;  %p1689_p5 = scmp.lt.s32.totalorder %s262_s27, %s1687_s6 }
  0x63   : > { %p1684_p12 = pnand %p1682_p0, %p1670_p10  ;;  %p1690_p7 = scmp.lt.s32.totalorder %s1688_s15, %s1681_s7 }
  0x65   : > { %p1685_p2 = pneg %p1684_p12  ;;  %p1691_p8 = por %p1690_p7, %p1689_p5 }
  0x67   : > { %p1692_p6 = pnand %p1691_p8, %p1685_p2 }
  0x69   : > { %1695 = shalt.err (!%p1692_p6)
}
  0x6a   : > { %s2333_s16 = smov 8   ;;  %s2334_s18 = smov 128  }
  0x6b   : > { %1426 = dma.hbm_to_vmem [thread:$0]  (!%p2075_p9), %s2063_s3, 256, %s262_s27, %s251_s2, %s2334_s18, %s2334_s18, %s2333_s16  }
  0x6c   : > { %273 = sbr.rel (%p1975_p11) target bundleno = 1813 (0x715), region = 40  ;;  %s275_s1 = sand.u32 (!%p1975_p11), 1, %s1808_s22  }
  0x6d   : > { %s1239_s11 = sshll.u32 (!%p1975_p11), %s275_s1, 4  ;;  %s276_s17 = scalar_lea.sflag (!%p1975_p11), [#allocation6], %s275_s1 }
  0x6e   : > { %s2090_s5 = scalar_lea.vmem (!%p1975_p11), [#allocation5], %s1239_s11 }
  0x71   : > { %1775 = dma.done.wait (%p1959_p4), %s276_s17, 256  }
  0x72   : > { %1777 = vsyncadd (%p1959_p4), %s276_s17, 4294967040 }
  0x73   : > { %1779 = dma.done.wait (%p1951_p1), [#allocation9], 2048  }
  0x74   : > { %1781 = vsyncadd (%p1951_p1), [#allocation9], 4294965248 }
  0x75   : > { %1783 = dma.done.wait (%p1951_p1), [#allocation12], 2048  }
  0x76   : > { %1785 = vsyncadd (%p1951_p1), [#allocation12], 4294965248  ;;  %s319_s3 = sand.u32 1, %s1796_s19   ;;  %s1245_s27 = sshll.u32 %s1816_s24, 5 }
  0x77   : > { %s2108_s9 = sshll.u32 %s319_s3, 3  ;;  %s323_s12 = scalar_lea.vmem [#allocation8], %s1245_s27 }
  0x78   : > { %v2110_v0 = vld [vmem:[%s323_s12] sm:$0xff]  ;;  %v2112_v1 = vld [vmem:[%s323_s12 + $0x8] sm:$0xff]  ;;  %v2114_v2 = vld [vmem:[%s323_s12 + $0x10] sm:$0xff]  ;;  %s328_s8 = scalar_lea.vmem [#allocation13], %s1245_s27  ;;  %s321_s14 = scalar_lea.vmem [#allocation14], %s2108_s9 }
  0x79   : > { %v2116_v3 = vld [vmem:[%s323_s12 + $0x18] sm:$0xff]  ;;  %v2118_v4 = vld [vmem:[%s328_s8] sm:$0xff]  ;;  %v2120_v5 = vld [vmem:[%s328_s8 + $0x8] sm:$0xff]  ;;  %p1246_p1 = scmp.ne.s32.totalorder %s1816_s24, 0 }
  0x7a   : > { %v2122_v6 = vld [vmem:[%s328_s8 + $0x10] sm:$0xff]  ;;  %v2124_v7 = vld [vmem:[%s328_s8 + $0x18] sm:$0xff] }
  0x7b   : > { %336 = sbr.rel (%p1246_p1) target bundleno = 130 (0x82), region = 64 }
  0x80   : > { %vm337_vm0 = vcmask 523264   ;;  %v1849_v8 = vmov 0.0  }
  0x81   : > { %338 = vst.msk [vmem:[#allocation4] sm:$0xff] %vm337_vm0, %v1849_v8 }
  0x82 PF: > { %p1247_p4 = scmp.ne.s32.totalorder %s1820_s25, 0 }
  0x83   : > { %s345_s21 = scalar_lea.vmem (!%p1247_p4), [#allocation10], %s1245_s27  ;;  %s350_s2 = scalar_lea.vmem (!%p1247_p4), [#allocation11], %s1245_s27 }
  0x84   : > { %342 = sbr.rel (%p1247_p4) target bundleno = 352 (0x160), region = 68  ;;  %s1254_s7 = sshll.u32 (!%p1247_p4), %s1816_s24, 4 }
  0x85   : > { %s450_s4 = scalar_lea.vmem (!%p1247_p4), [#allocation2], %s1254_s7  ;;  %s541_s6 = scalar_lea.vmem (!%p1247_p4), [#allocation3], %s1254_s7 }
  0x89   : > { %vm355_vm1 = vcmask 523264   ;;  %v343_v9 = vld [vmem:[%s2090_s5] sm:$0xff]  ;;  %v348_v12 = vld [vmem:[%s345_s21 + $0x10] sm:$0xff]  ;;  %v346_v16 = vld [vmem:[%s345_s21] sm:$0xff]  ;;  %vm451_vm2 = vcmask 261120  }
  0x8a   : > { %v349_v10 = vld [vmem:[%s345_s21 + $0x18] sm:$0xff]  ;;  %1326 = vmatprep.mubr.msk.f32.mxu0 %vm355_vm1, %v343_v9  ;;  %1337 = vmatprep.mubr.msk.f32.mxu1 %vm355_vm1, %v343_v9  ;;  %v353_v13 = vld [vmem:[%s350_s2 + $0x10] sm:$0xff]  ;;  %v347_v14 = vld [vmem:[%s345_s21 + $0x8] sm:$0xff] }
  0x8b   : > { %v354_v11 = vld [vmem:[%s350_s2 + $0x18] sm:$0xff]  ;;  %1318 = vmatprep.subr.msk.mxu0 %vm355_vm1, %v349_v10  ;;  %v352_v15 = vld [vmem:[%s350_s2 + $0x8] sm:$0xff]  ;;  %v351_v17 = vld [vmem:[%s350_s2] sm:$0xff] }
  0x8c   : > { %1329 = vmatprep.subr.msk.mxu1 %vm355_vm1, %v354_v11  ;;  %1319 = vmatpush3.xpose.msk.msra.mxu0 %vm355_vm1, %v349_v10  ;;  %v344_v18 = vld [vmem:[%s2090_s5 + $0x8] sm:$0xff] }
  0x8d   : > { %1330 = vmatpush3.xpose.msk.msra.mxu1 %vm355_vm1, %v354_v11  ;;  %1320 = vmatprep.subr.msk.mxu0 %vm355_vm1, %v348_v12 }
  0x8e   : > { %1331 = vmatprep.subr.msk.mxu1 %vm355_vm1, %v353_v13 }
  0x90   : > { %1321 = vmatpush3.xpose.msk.msra.mxu0 %vm355_vm1, %v348_v12 }
  0x91   : > { %1332 = vmatpush3.xpose.msk.msra.mxu1 %vm355_vm1, %v353_v13  ;;  %1322 = vmatprep.subr.msk.mxu0 %vm355_vm1, %v347_v14 }
  0x92   : > { %1333 = vmatprep.subr.msk.mxu1 %vm355_vm1, %v352_v15 }
  0x94   : > { %1323 = vmatpush3.xpose.msk.msra.mxu0 %vm355_vm1, %v347_v14 }
  0x95   : > { %1334 = vmatpush3.xpose.msk.msra.mxu1 %vm355_vm1, %v352_v15  ;;  %1324 = vmatprep.subr.msk.mxu0 %vm355_vm1, %v346_v16 }
  0x96   : > { %1335 = vmatprep.subr.msk.mxu1 %vm355_vm1, %v351_v17 }
  0x98   : > { %1325 = vmatpush3.xpose.msk.msra.mxu0 %vm355_vm1, %v346_v16 }
  0x99   : > { %1336 = vmatpush3.xpose.msk.msra.mxu1 %vm355_vm1, %v351_v17 }
  0x9b   : > { %1327 = vmatmul.mubr.msk.f32.vlgmr.msra.gmra.mxu0 %vm355_vm1, %v344_v18 }
  0x9c   : > { %1338 = vmatmul.mubr.msk.f32.vlgmr.msra.gmra.mxu1 %vm355_vm1, %v344_v18 }
 0x15b   : > { %v1328_v19 = vpop.f32.mrf.mxu0 }
 0x15c   : > { %v1339_v20 = vpop.f32.mrf.mxu1  ;;  %453 = vst.msk [vmem:[%s450_s4 + $0x8] sm:$0xff] %vm451_vm2, %v1328_v19 }
 0x15d   : > { %543 = vst.msk [vmem:[%s541_s6 + $0x8] sm:$0xff] %vm451_vm2, %v1339_v20  ;;  %v440_v21 = vpop.f32.mrf.mxu0 }
 0x15e   : > { %v532_v22 = vpop.f32.mrf.mxu1  ;;  %452 = vst.msk [vmem:[%s450_s4] sm:$0xff] %vm451_vm2, %v440_v21 }
 0x15f   : > { %542 = vst.msk [vmem:[%s541_s6] sm:$0xff] %vm451_vm2, %v532_v22 }
 0x160 PF: > { %vm547_vm3 = vcmask 523264   ;;  %s1267_s15 = sshll.u32 %s1816_s24, 4  ;;  %vm640_vm4 = vcmask 130048   ;;  %v1850_v23 = vmov 0.0   ;;  %vm1851_vm5 = vmmov 0   ;;  %s1852_s18 = smov 112  }
 0x161   : > { %1340 = vmatprep.subr.mxu0 %v1850_v23  ;;  %1348 = vmatprep.mubr.msk.f32.mxu0 %vm1851_vm5, %v1850_v23  ;;  %s634_s16 = scalar_lea.vmem [#allocation2], %s1267_s15  ;;  %s1261_s1 = sshll.u32 %s1820_s25, 3  ;;  %vm984_vm6 = vcmask 261120  }
 0x162   : > { %1341 = vmatpush3.xpose.msk.msra.mxu0 %vm547_vm3, %v2116_v3  ;;  %1351 = vmatprep.subr.mxu1 %v1850_v23  ;;  %s545_s11 = scalar_lea.vmem %s2090_s5, %s1261_s1 [#allocation5]  ;;  %s637_s17 = scalar_lea.vmem [#allocation3], %s1267_s15 }
 0x163   : > { %1342 = vmatprep.subr.mxu0 %v1850_v23  ;;  %1355 = vmatprep.mubr.msk.f32.mxu1 %vm1851_vm5, %v1850_v23  ;;  %v546_v26 = vld [vmem:[%s545_s11] sm:$0xff]  ;;  %s1853_s5 = smov 16   ;;  %p1277_p6 = scmp.ne.s32.totalorder %s1816_s24, 1 }
 0x165   : > { %v636_v24 = vld [vmem:[%s634_s16 + $0x8] sm:$0xff]  ;;  %v635_v25 = vld [vmem:[%s634_s16] sm:$0xff] }
 0x166   : > { %1352 = vmatpush3.xpose.msk.msra.mxu1 %vm640_vm4, %v636_v24  ;;  %806 = vrot.lane.b32.xlu1 %v635_v25, %s1852_s18  ;;  %v639_v32 = vld [vmem:[%s637_s17 + $0x8] sm:$0xff]  ;;  %v638_v33 = vld [vmem:[%s637_s17] sm:$0xff] }
 0x167   : > { %1353 = vmatprep.subr.mxu1 %v1850_v23  ;;  %1343 = vmatpush3.xpose.msk.msra.mxu0 %vm547_vm3, %v2114_v2 }
 0x168   : > { %1344 = vmatprep.subr.mxu0 %v1850_v23 }
 0x16a   : > { %1354 = vmatpush3.xpose.msk.msra.mxu1 %vm640_vm4, %v635_v25 }
 0x16b   : > { %1358 = vmatprep.subr.mxu1 %v1850_v23  ;;  %1345 = vmatpush3.xpose.msk.msra.mxu0 %vm547_vm3, %v2112_v1 }
 0x16c   : > { %1346 = vmatprep.subr.mxu0 %v1850_v23 }
 0x16f   : > { %1347 = vmatpush3.xpose.msk.msra.mxu0 %vm547_vm3, %v2110_v0  ;;  %v983_v0 = vld [vmem:[#allocation4] sm:$0xff] }
 0x170   : > { %1379 = vmatprep.subr.mxu0 %v1850_v23 }
 0x172   : > { %1349 = vmatmul.mubr.msk.f32.vlgmr.msra.gmra.mxu0 %vm547_vm3, %v546_v26 }
 0x173   : > { %1380 = vmatpush3.msra.mxu0 %v2124_v7  ;;  %1387 = vmatprep.mubr.msk.f32.mxu0 %vm1851_vm5, %v1850_v23 }
 0x174   : > { %1381 = vmatprep.subr.mxu0 %v1850_v23 }
 0x175   : > { %1382 = vmatpush3.msra.mxu0 %v2122_v6 }
 0x176   : > { %1383 = vmatprep.subr.mxu0 %v1850_v23 }
 0x177   : > { %1384 = vmatpush3.msra.mxu0 %v2120_v5 }
 0x178   : > { %1385 = vmatprep.subr.mxu0 %v1850_v23 }
 0x179   : > { %1386 = vmatpush3.msra.mxu0 %v2118_v4 }
 0x1d8   : > { %v807_v39 = vpop.permute.xlu1 %806 }
 0x232   : > { %v629_v27 = vpop.f32.mrf.mxu0 }
 0x233   : > { %804 = vrot.lane.b32.xlu1 %v629_v27, %s1852_s18  ;;  %1356 = vmatmul.mubr.msk.f32.vlgmr.msra.gmra.mxu1 %vm640_vm4, %v629_v27 }
 0x234   : > { %v1350_v28 = vpop.f32.mrf.mxu0  ;;  %1362 = vmatprep.mubr.msk.f32.mxu1 %vm1851_vm5, %v1850_v23  ;;  %1359 = vmatpush3.msra.mxu1 %v639_v32 }
 0x235   : > { %1360 = vmatprep.subr.mxu1 %v1850_v23 }
 0x236   : > { %1361 = vmatpush3.msra.mxu1 %v638_v33 }
 0x237   : > { %1365 = vmatprep.subr.mxu1 %v1850_v23 }
 0x2a5   : > { %v805_v40 = vpop.permute.xlu1 %804 }
 0x2f3   : > { %v716_v29 = vpop.f32.mrf.mxu1 }
 0x2f4   : > { %v720_v30 = vsel %vm640_vm4, %v716_v29, -inf }
 0x2f5   : > { %721 = vmax.xlane.f32.xlu0 %v720_v30  ;;  %v1357_v31 = vpop.f32.mrf.mxu1 }
 0x30b   : > { %808 = vrot.lane.b32.xlu0 %v636_v24, %s1852_s18 }
 0x30f   : > { %899 = vrot.lane.b32.xlu0 %v639_v32, %s1852_s18 }
 0x313   : > { %897 = vrot.lane.b32.xlu0 %v638_v33, %s1852_s18 }
 0x37e   : > { %v722_v34 = vpop.xlane.xlu0 %721 }
 0x37f   : > { %v723_v35 = vsub.f32 %v716_v29, %v722_v34 }
 0x381   : > { %v724_v36 = vmul.f32 1.442695, %v723_v35 }
 0x382   : > { %v809_v37 = vpop.permute.xlu0 %808 }
 0x383   : > { %1556 = vpow2.f32 %v724_v36 }
 0x386   : > { %v900_v47 = vpop.permute.xlu0 %899 }
 0x38a   : > { %v898_v48 = vpop.permute.xlu0 %897 }
 0x390   : > { %v1557_v38 = vpop.eup %1556 }
 0x391   : > { %1363 = vmatmul.mubr.msk.f32.vlgmr.msra.gmra.mxu1 %vm640_vm4, %v1557_v38  ;;  %v726_v46 = vsel %vm640_vm4, %v1557_v38, 0.0 }
 0x392   : > { %1366 = vmatpush3.xpose.msk.msra.mxu1 %vm640_vm4, %v809_v37  ;;  %1369 = vmatprep.mubr.msk.f32.mxu1 %vm1851_vm5, %v1850_v23 }
 0x393   : > { %1367 = vmatprep.subr.mxu1 %v1850_v23 }
 0x396   : > { %1368 = vmatpush3.xpose.msk.msra.mxu1 %vm640_vm4, %v807_v39 }
 0x397   : > { %1372 = vmatprep.subr.mxu1 %v1850_v23 }
 0x399   : > { %1370 = vmatmul.mubr.msk.f32.vlgmr.msra.gmra.mxu1 %vm640_vm4, %v805_v40 }
 0x39a   : > { %1376 = vmatprep.mubr.msk.f32.mxu1 %vm1851_vm5, %v1850_v23  ;;  %1373 = vmatpush3.msra.mxu1 %v900_v47 }
 0x39b   : > { %1374 = vmatprep.subr.mxu1 %v1850_v23 }
 0x39c   : > { %1375 = vmatpush3.msra.mxu1 %v898_v48 }
 0x451   : > { %v798_v41 = vpop.f32.mrf.mxu1 }
 0x453   : > { %v1364_v42 = vpop.f32.mrf.mxu1 }
 0x459   : > { %v882_v43 = vpop.f32.mrf.mxu1 }
 0x45a   : > { %v886_v44 = vsel %vm640_vm4, %v882_v43, -inf }
 0x45b   : > { %887 = vmax.xlane.f32.xlu1 %v886_v44  ;;  %v1371_v45 = vpop.f32.mrf.mxu1 }
 0x45f   : > { %727 = vadd.xlane.f32.xlu1 %v726_v46 }
 0x4e4   : > { %v888_v49 = vpop.xlane.xlu1 %887 }
 0x4e5   : > { %v889_v50 = vsub.f32 %v882_v43, %v888_v49 }
 0x4e7   : > { %v890_v51 = vmul.f32 1.442695, %v889_v50 }
 0x4e8   : > { %v728_v59 = vpop.xlane.xlu1 %727 }
 0x4e9   : > { %1558 = vpow2.f32 %v890_v51 }
 0x4f6   : > { %v1559_v52 = vpop.eup %1558 }
 0x4f7   : > { %1377 = vmatmul.mubr.msk.f32.vlgmr.msra.gmra.mxu1 %vm640_vm4, %v1559_v52  ;;  %v892_v53 = vsel %vm640_vm4, %v1559_v52, 0.0 }
 0x4f8   : > { %893 = vadd.xlane.f32.xlu0 %v892_v53 }
 0x581   : > { %v894_v54 = vpop.xlane.xlu0 %893 }
 0x582   : > { %1560 = vrcp.f32 %v894_v54 }
 0x583   : > { %1562 = vrcp.f32 %v728_v59 }
 0x58f   : > { %v1561_v55 = vpop.eup %1560 }
 0x590   : > { %v1563_v60 = vpop.eup %1562 }
 0x591   : > { %v803_v61 = vmul.f32 %v1563_v60, %v798_v41 }
 0x5b7   : > { %v972_v56 = vpop.f32.mrf.mxu1 }
 0x5b8   : > { %v977_v57 = vmul.f32 %v1561_v55, %v972_v56 }
 0x5b9   : > { %v1378_v58 = vpop.f32.mrf.mxu1 }
 0x5ba   : > { %979 = vrot.lane.b32.xlu1 %v977_v57, %s1853_s5 }
 0x62c   : > { %v980_v62 = vpop.permute.xlu1 %979 }
 0x62d   : > { %v982_v63 = vsel %vm640_vm4, %v803_v61, %v980_v62 }
 0x62e   : > { %1388 = vmatmul.mubr.msk.f32.vlgmr.msra.gmra.mxu0 %vm984_vm6, %v982_v63 }
 0x6ed   : > { %1063 = sbr.rel (%p1277_p6) target bundleno = 1786 (0x6fa), region = 72 }
 0x6ee   : > { %v1054_v1 = vpop.f32.mrf.mxu0 }
 0x6ef   : > { %v1058_v2 = vadd.f32 %v1054_v1, %v983_v0 }
 0x6f0   : > { %v1389_v3 = vpop.f32.mrf.mxu0 }
 0x6f1   : > { %1059 = vst.msk [vmem:[#allocation4] sm:$0xff] %vm547_vm3, %v1058_v2 }
 0x6f8   : > { %v1064_v4 = vld [vmem:[#allocation4] sm:$0xff] }
 0x6f9   : > { %1065 = vst.msk [vmem:[%s321_s14] sm:$0xff] %vm547_vm3, %v1064_v4 }
 0x6fa PF: > { %s2335_s27 = sld [smem:[#allocation20_spill]]  ;;  %s1082_s2 = sshll.u32 %s321_s14, 4  ;;  %s1083_s2 = int_to_ptr.vmem [resolvable:$true] %s1082_s2 }
 0x6fb   : > { %s2336_s12 = sld [smem:[#allocation22_spill]]  ;;  %s1067_s16 = scalar_lea.sflag [#allocation7], %s319_s3 }
 0x6fc   : > { %s2337_s6 = sld [smem:[#allocation30_spill]]  ;;  %s1696_s18 = scalar_lea.vmem %s1083_s2, 128 }
 0x6fd   : > { %p1697_p11 = scmp.ne.s32.totalorder %s1083_s2, %s1696_s18  ;;  %s1854_s1 = smov [#allocation14]  }
 0x6fe   : > { %s1700_s11 = sshll.u32 %s1854_s1, 4  ;;  %s1701_s11 = int_to_ptr.vmem [resolvable:$false] %s1700_s11 }
 0x6ff   : > { %s1702_s17 = scalar_lea.vmem %s1701_s11, 256  ;;  %p1703_p10 = scmp.lt.s32.totalorder %s1083_s2, %s1701_s11 }
 0x700   : > { %s1279_s8 = sshll.u32 %s2335_s27, 1  ;;  %p1704_p0 = scmp.lt.s32.totalorder %s1702_s17, %s1696_s18 }
 0x701   : > { %s1078_s21 = sadd.s32 %s1820_s25, %s1279_s8  ;;  %p2338_p3 = scmp.ne.s32.totalorder %s2336_s12, 0 }
 0x702   : > { %s1280_s7 = sshll.u32 %s1078_s21, 7  ;;  %p1705_p12 = por %p1704_p0, %p1703_p10 }
 0x703   : > { %s1080_s15 = scalar_lea.hbm %s2337_s6, %s1280_s7  ;;  %p1698_p13 = pnand %p1697_p11, %p2338_p3 }
 0x705   : > { %p1699_p9 = pneg %p1698_p13 }
 0x707   : > { %p1706_p2 = pnand %p1705_p12, %p1699_p9 }
 0x709   : > { %1709 = shalt.err (!%p1706_p2)
}
 0x70a   : > { %s1710_s25 = scalar_lea.hbm %s1080_s15, 128  ;;  %s1714_s14 = scalar_lea.hbm %s2337_s6, 512 }
 0x70b   : > { %p1711_p5 = scmp.ne.s32.totalorder %s1080_s15, %s1710_s25  ;;  %p1715_p1 = scmp.lt.s32.totalorder %s1080_s15, %s2337_s6 }
 0x70c   : > { %p1716_p4 = scmp.lt.s32.totalorder %s1714_s14, %s1710_s25 }
 0x70d   : > { %p1712_p7 = pnand %p1711_p5, %p2338_p3 }
 0x70e   : > { %p1717_p6 = por %p1716_p4, %p1715_p1 }
 0x70f   : > { %p1713_p8 = pneg %p1712_p7 }
 0x711   : > { %p1718_p11 = pnand %p1717_p6, %p1713_p8 }
 0x713   : > { %1721 = shalt.err (!%p1718_p11)
}
 0x714   : > { %1408 = dma.vmem_to_hbm [thread:$0]  (%p2338_p3), %s1083_s2, 128, %s1080_s15, %s1067_s16  }
 0x715 PF: > { %s2339_s8 = sld [smem:[#allocation19_spill]]  ;;  %p1440_p13 = scmp.ge.s32.totalorder %s1840_s30, 2 }
 0x716   : > { %s2340_s21 = sld [smem:[#allocation23_spill]] }
 0x71b   : > { %s1094_s7 = sand.u32 1, %s2339_s8  }
 0x71c   : > { %p2341_p9 = scmp.ne.s32.totalorder %s2340_s21, 0  ;;  %s1095_s4 = scalar_lea.sflag [#allocation7], %s1094_s7 }
 0x71e   : > { %p1428_p10 = pnand %p1440_p13, %p2341_p9 }
 0x720   : > { %p1429_p0 = pneg %p1428_p10 }
 0x722   : > { %1787 = dma.done.wait (%p1429_p0), %s1095_s4, 128  }
 0x723   : > { %1789 = vsyncadd (%p1429_p0), %s1095_s4, 4294967168  ;;  %s23_s30 = sadd.s32 1, %s1840_s30   ;;  %s2343_s12 = sld [smem:[#allocation21_spill]] }
 0x724   : > { %p2249_p12 = scmp.ge.s32.totalorder %s23_s30, 10   ;;  %s2344_s27 = sld [smem:[#allocation24_spill]] }
 0x725   : > { %s2345_s2 = sld [smem:[#allocation25_spill]]  ;;  %s2347_s18 = smov %s1796_s19 }
 0x726   : > { %s2348_s19 = smov %s1800_s20  ;;  %s2349_s20 = smov %s2069_s26 }
 0x727   : > { %s2350_s21 = smov %s1808_s22  ;;  %s2351_s22 = smov %s1812_s23 }
 0x728   : > { %s2352_s23 = smov %s2066_s10  ;;  %s2354_s25 = smov %s1832_s28 }
 0x729   : > { %s2353_s24 = smov %s2343_s12  ;;  %s2355_s26 = smov %s1836_s29 }
 0x72a   : > { %s2357_s29 = smov %s2367_s13  ;;  %22 = sbr.rel (!%p2249_p12) target bundleno = 18 (0x12), region = 122 }
 0x72b   : > { %s2356_s28 = smov %s2345_s2 }
 0x72f   :  { %1100 = vsyncpa [#allocation6], 1 }
 0x730   :  { %1102 = vsyncpa [#allocation6 + $0x1], 1 }
 0x731   :  { %1103 = vsyncpa [#allocation9], 1 }
 0x732   :  { %1104 = vsyncpa [#allocation12], 1 }
 0x733   :  { %1105 = vsyncpa [#allocation7], 1 }
 0x734   :  { %1107 = vsyncpa [#allocation7 + $0x1], 1 }

</bundles_post_ra>
